<compile_context>
chip_gen: v5e
topology: v5e:2x2
jax: 0.10.0
libtpu: 0.0.40
codegen_flags: <defaults>
</compile_context>

<pallas_src>
import jax
import jax.numpy as jnp
from jax.experimental import pallas as pl
from jax.experimental.pallas import tpu as pltpu


def _round_up(a: int, b: int) -> int:
    return (a + b - 1) // b * b


# ---------------------------------------------------------------------------
# Fast path: nn.Linear(1, 1) is a scalar FMA, y = x * w + b. Pure VPU.
# ---------------------------------------------------------------------------
def _fma_kernel(x_ref, w_ref, b_ref, o_ref):
    o_ref[...] = x_ref[...] * w_ref[0, 0] + b_ref[0, 0]


def _linear_1x1(x, weight, bias):
    n = x.shape[0]
    return pl.pallas_call(
        _fma_kernel,
        out_shape=jax.ShapeDtypeStruct((n, 1), x.dtype),
        in_specs=[
            pl.BlockSpec(memory_space=pltpu.MemorySpace.VMEM),   # x (n, 1)
            pl.BlockSpec(memory_space=pltpu.MemorySpace.SMEM),   # w (1, 1)
            pl.BlockSpec(memory_space=pltpu.MemorySpace.SMEM),   # b (1, 1)
        ],
        out_specs=pl.BlockSpec(memory_space=pltpu.MemorySpace.VMEM),
    )(x, weight.reshape(1, 1), bias.reshape(1, 1))


# ---------------------------------------------------------------------------
# General path: tiled MXU matmul, f32 accumulation directly in the output
# block (resident across the K grid axis), bias added in the K epilogue.
# ---------------------------------------------------------------------------
def _linear_mxu_kernel(x_ref, wt_ref, b_ref, o_ref):
    k = pl.program_id(2)

    @pl.when(k == 0)
    def _():
        o_ref[...] = jnp.zeros_like(o_ref)

    # wt_ref is already (in, out): plain contraction, no in-kernel transpose.
    o_ref[...] += jnp.dot(
        x_ref[...], wt_ref[...], preferred_element_type=jnp.float32
    )

    @pl.when(k == pl.num_programs(2) - 1)
    def _():
        o_ref[...] += b_ref[...]   # bias added exactly once


def linear_forward(x, weight, bias, *, tm=512, tn=512, tk=1024,
                   input_dtype=None):
    """y = x @ weight.T + bias, matching torch.nn.Linear semantics."""
    n, in_f = x.shape
    out_f, in_f_w = weight.shape
    assert in_f == in_f_w, "weight shape must be (out_features, in_features)"

    # Degenerate small case (this module's actual shape): pure VPU FMA.
    if in_f == 1 and out_f == 1:
        return _linear_1x1(x, weight, bias)

    w_t = weight.T                 # (in, out) — pre-transposed once
    bias2d = bias.reshape(1, out_f)

    # Hardware legality: sublane multiple of 8, lane multiple of 128.
    m_legal = _round_up(n, 8)
    k_legal = _round_up(in_f, 128)
    n_legal = _round_up(out_f, 128)

    # Clamp tiles to the legalized problem (stay 8/128 aligned).
    tm = min(tm, m_legal)
    tk = min(tk, k_legal)
    tn = min(tn, n_legal)

    # K zero-padded to a tile multiple (feeds the contraction -> must be 0).
    # N padded to a tile multiple (lane-dense stores, simple bias tiling).
    # M padded only to legality; the ragged last M block is handled by
    # masked writes (pl.cdiv grid), not by dead padded rows.
    k_pad = _round_up(k_legal, tk)
    n_pad = _round_up(n_legal, tn)

    x_p = jnp.pad(x, ((0, m_legal - n), (0, k_pad - in_f)))
    w_p = jnp.pad(w_t, ((0, k_pad - in_f), (0, n_pad - out_f)))
    b_p = jnp.pad(bias2d, ((0, 0), (0, n_pad - out_f)))

    # Optional bf16 MXU inputs (accumulation stays f32). Off by default to
    # preserve exact f32 numerics.
    if input_dtype is not None:
        x_p = x_p.astype(input_dtype)
        w_p = w_p.astype(input_dtype)

    grid = (pl.cdiv(m_legal, tm), n_pad // tn, k_pad // tk)

    out = pl.pallas_call(
        _linear_mxu_kernel,
        out_shape=jax.ShapeDtypeStruct((m_legal, n_pad), jnp.float32),
        grid_spec=pltpu.PrefetchScalarGridSpec(
            num_scalar_prefetch=0,
            grid=grid,
            in_specs=[
                pl.BlockSpec((tm, tk), lambda i, j, k: (i, k)),   # x tile
                pl.BlockSpec((tk, tn), lambda i, j, k: (k, j)),   # W^T tile
                pl.BlockSpec((1, tn), lambda i, j, k: (0, j)),    # bias tile
            ],
            out_specs=pl.BlockSpec((tm, tn), lambda i, j, k: (i, j)),
        ),
        compiler_params=pltpu.CompilerParams(
            dimension_semantics=("parallel", "parallel", "arbitrary"),
            vmem_limit_bytes=48 * 1024 * 1024,
        ),
        cost_estimate=pl.CostEstimate(
            flops=2 * m_legal * k_pad * n_pad,
            transcendentals=0,
            bytes_accessed=(x_p.size * x_p.dtype.itemsize
                            + w_p.size * w_p.dtype.itemsize
                            + b_p.size * 4
                            + m_legal * n_pad * 4),
        ),
    )(x_p, w_p, b_p)

    # Strip lane padding, restore the caller dtype.
    return out[:n, :out_f].astype(x.dtype)


if __name__ == "__main__":
    key = jax.random.PRNGKey(0)
    kx, kw, kb, kx2, kw2, kb2 = jax.random.split(key, 6)

    fwd = jax.jit(linear_forward)

    # --- Shapes implied by the module: nn.Linear(1, 1, bias=True) ---------
    batch, in_features, out_features = 8, 1, 1
    x = jax.random.normal(kx, (batch, in_features), dtype=jnp.float32)
    bound = 1.0 / (in_features ** 0.5)
    weight = jax.random.uniform(kw, (out_features, in_features),
                                minval=-bound, maxval=bound,
                                dtype=jnp.float32)
    bias = jax.random.uniform(kb, (out_features,),
                              minval=-bound, maxval=bound, dtype=jnp.float32)

    y = fwd(x, weight, bias)
    jax.block_until_ready(y)
    y_ref = x @ weight.T + bias[None, :]
    assert y.shape == (batch, out_features)
    assert jnp.allclose(y, y_ref, atol=1e-5, rtol=1e-5)

    # --- Secondary self-check: exercises the tiled MXU path ---------------
    # (multi-K accumulation, zero-padded K, ragged last M block, N padding)
    M, K, N = 600, 2500, 200
    x2 = jax.random.normal(kx2, (M, K), dtype=jnp.float32)
    w2 = jax.random.normal(kw2, (N, K), dtype=jnp.float32) / (K ** 0.5)
    b2 = jax.random.normal(kb2, (N,), dtype=jnp.float32)
    y2 = fwd(x2, w2, b2)
    jax.block_until_ready(y2)
    y2_ref = (jnp.dot(x2, w2.T, precision=jax.lax.Precision.HIGHEST)
              + b2[None, :])
    assert y2.shape == (M, N)
    assert jnp.allclose(y2, y2_ref, atol=1e-3, rtol=1e-3)

    print("KERNEL_OK")
</pallas_src>

<mosaic_0001>
module attributes {stable_mosaic.version = 11 : i64} {
  func.func @_fma_kernel(%arg0: memref<8x1xf32, #tpu.memory_space<vmem>>, %arg1: memref<1x1xf32, #tpu.memory_space<smem>>, %arg2: memref<1x1xf32, #tpu.memory_space<smem>>, %arg3: memref<8x1xf32, #tpu.memory_space<vmem>>) attributes {dimension_semantics = [], scalar_prefetch = 0 : i64, scratch_operands = 0 : i64, tpu.core_type = #tpu.core_type<tc>} {
    %c0 = arith.constant 0 : index
    %c0_0 = arith.constant 0 : index
    %0 = vector.load %arg0[%c0, %c0_0] : memref<8x1xf32, #tpu.memory_space<vmem>>, vector<8x1xf32>
    %c0_1 = arith.constant 0 : index
    %c0_2 = arith.constant 0 : index
    %1 = memref.load %arg1[%c0_1, %c0_2] : memref<1x1xf32, #tpu.memory_space<smem>>
    %2 = vector.broadcast %1 : f32 to vector<8x1xf32>
    %3 = arith.mulf %0, %2 : vector<8x1xf32>
    %c0_3 = arith.constant 0 : index
    %c0_4 = arith.constant 0 : index
    %4 = memref.load %arg2[%c0_3, %c0_4] : memref<1x1xf32, #tpu.memory_space<smem>>
    %5 = vector.broadcast %4 : f32 to vector<8x1xf32>
    %6 = arith.addf %3, %5 : vector<8x1xf32>
    %c0_5 = arith.constant 0 : index
    %c0_6 = arith.constant 0 : index
    %7 = vector.load %arg3[%c0_5, %c0_6] : memref<8x1xf32, #tpu.memory_space<vmem>>, vector<8x1xf32>
    tpu.vector_store %arg3[%c0_5, %c0_6], %6 {strides = array<i32>} : memref<8x1xf32, #tpu.memory_space<vmem>>, vector<8x1xf32>,
    return
  }
}

</mosaic_0001>

<bundles_post_ra>
// kernel: linear_forward.1
= control target key start
LH: loop header
LB: loop body
LE: loop exit
PB: predicated region body
PF: predicated region fallthrough
CT: control target
= control target key end

     0   :  { %vm23_vm0 = vcmask 7168   ;;  %s61_s0 = inlined_call_operand.vmem [shape: f32[8,1], index: 0, kind: input, shape index: {}]   ;;  %s62_s1 = inlined_call_operand.<no memory space> [shape: f32[1,1], index: 1, kind: input, shape index: {}]   ;;  %s63_s2 = inlined_call_operand.<no memory space> [shape: f32[1,1], index: 2, kind: input, shape index: {}]   ;;  %s64_s3 = inlined_call_operand.vmem [shape: f32[8,1], index: 3, kind: output, shape index: {}]  }
   0x1   :  { %v16_v0 = vld [vmem:[%s61_s0] sm:$0xff]  ;;  %v18_v1 = vstv %s62_s1  ;;  %v21_v2 = vstv %s63_s2 }
   0x2   :  { %v19_v3 = vmul.f32 %v18_v1, %v16_v0 }
   0x4   :  { %v22_v4 = vadd.f32 %v21_v2, %v19_v3 }
   0x6   :  { %24 = vst.msk [vmem:[%s64_s3] sm:$0xff] %vm23_vm0, %v22_v4 }

</bundles_post_ra>
